<compile_context>
chip_gen: v7x
topology: tpu7x:2x2x1
jax: 0.10.0
libtpu: 0.0.40
codegen_flags: <defaults>
</compile_context>

<pallas_src>
import functools
from dataclasses import dataclass

import jax
import jax.numpy as jnp
import numpy as np
from jax.experimental import pallas as pl
from jax.experimental.pallas import tpu as pltpu


@dataclass(frozen=True)
class DirectLayerConfig:
    num_heads: int = 4
    sub_heads: int = 2
    input_dim: int = 32
    JO: int = 2
    JQ: int = 2
    JK: int = 2
    JV: int = 2
    weight: bool = True
    activation: str = "tanh"          # 'identity' | 'tanh' | 'logsigmoid'
    activation_scale: float = 2.0


_TARGET_STEP_BYTES = 6 * 1024 * 1024     # HBM traffic per grid step
_VMEM_BUDGET_BYTES = 24 * 1024 * 1024    # double-buffered block budget (v7x-safe)


# ---------------------------------------------------------------------------
# Activations
# ---------------------------------------------------------------------------
def _activation_reference(x, activation, scale):
    """Exact PyTorch formulation (reference + bias-only path)."""
    if activation == "identity":
        return x
    if activation == "tanh":
        return scale * jnp.tanh(x / scale)
    if activation == "logsigmoid":
        return jnp.exp(scale * jax.nn.log_sigmoid(x))
    raise ValueError("Bad source activation")


def _activation_kernel(x, activation, scale):
    """EUP-friendly rewrite: one transcendental per element."""
    if activation == "identity":
        return x
    if activation == "tanh":
        return scale * jnp.tanh(x * (1.0 / scale))
    if activation == "logsigmoid":
        # exp(scale * logsigmoid(x)) == sigmoid(x) ** scale
        s = jax.nn.sigmoid(x)
        iscale = int(round(scale))
        if float(scale) == float(iscale) and 1 <= iscale <= 8:
            return s ** iscale            # lax.integer_pow -> VPU multiplies
        return jnp.power(s, scale)
    raise ValueError("Bad source activation")


# ---------------------------------------------------------------------------
# Kernel
# ---------------------------------------------------------------------------
def _weighted_kernel(x_ref, w_ref, b_ref, o_ref, *, activation, scale):
    # x_ref: [tm, p*C]   w_ref: [p*C, p*F]   b_ref: [1, p*F]   o_ref: [tm, p*F]
    # Single fused MXU matmul over the (packed) block-diagonal weight, f32
    # accumulation, one broadcast bias add, one EUP transcendental per elem.
    y = jnp.dot(x_ref[...], w_ref[...], preferred_element_type=jnp.float32)
    r = y + b_ref[...]
    o_ref[...] = _activation_kernel(r, activation, scale).astype(o_ref.dtype)


# ---------------------------------------------------------------------------
# Wrapper
# ---------------------------------------------------------------------------
def _default_pack_factor():
    """p=4 -> K=128 (one v5e MXU tile); p=8 -> K=256 (v6e/v7x MXU width)."""
    try:
        kind = jax.devices()[0].device_kind.lower()
    except Exception:
        kind = ""
    return 4 if "v5" in kind else 8


def direct_layer_forward(x, bias, weight, cfg: DirectLayerConfig, *,
                         tile_m=None, pack=None, out_dtype=None):
    batch_shape = x.shape[:-1]
    M = int(np.prod(batch_shape)) if batch_shape else 1
    S = cfg.sub_heads
    D = cfg.input_dim // S
    Hper = cfg.num_heads // S
    J = cfg.JO * cfg.JQ * cfg.JK * cfg.JV
    F = cfg.num_heads * J
    C = cfg.input_dim
    j_dims = (cfg.JO, cfg.JQ, cfg.JK, cfg.JV)
    out_dtype = x.dtype if out_dtype is None else out_dtype

    if not cfg.weight:
        # Tiny elementwise op on 64 values: dispatching a custom call costs
        # more than the work; plain jnp, XLA fuses it with the broadcast.
        act_b = _activation_reference(bias, cfg.activation, cfg.activation_scale)
        return jnp.broadcast_to(act_b, (*batch_shape, cfg.num_heads, *j_dims))

    # ---- weighted path -----------------------------------------------------
    p = int(pack) if pack is not None else _default_pack_factor()
    p = max(1, p)

    x2 = x.reshape(M, C)
    M_pad = -(-M // p) * p
    if M_pad != M:
        x2 = jnp.pad(x2, ((0, M_pad - M), (0, 0)))
    Mp = M_pad // p
    xp = x2.reshape(Mp, p * C)                       # contiguous -> free

    # Block-diagonal per-sub-head weight [C, F], columns ordered (h, s, j)
    # so the flat output column n*J + j already matches num_heads = h*S + s.
    w4 = weight.reshape(Hper, S, J, D).transpose(1, 3, 0, 2)      # [S, D, Hper, J]
    eye_s = jnp.eye(S, dtype=w4.dtype)
    w_big = jnp.einsum("sdhj,st->sdhtj", w4, eye_s).reshape(C, F)
    # Pack p rows per kernel row: W_packed = I_p (x) w_big -> [p*C, p*F].
    w_pack = jnp.kron(jnp.eye(p, dtype=w_big.dtype), w_big)
    b_pack = jnp.tile(bias.reshape(1, F).astype(jnp.float32), (1, p))

    x_bytes = jnp.dtype(x.dtype).itemsize
    o_bytes = jnp.dtype(out_dtype).itemsize
    w_bytes = jnp.dtype(w_pack.dtype).itemsize

    # HBM traffic / VMEM footprint per packed row.
    row_hbm = p * C * x_bytes + p * F * o_bytes
    row_vmem = 2 * p * C * x_bytes + 2 * p * F * o_bytes + p * F * 4  # dbl-buf + f32 tmp
    resident = 2 * (p * C) * (p * F) * w_bytes + 2 * p * F * 4        # weight + bias

    if tile_m is not None:
        tm_p = max(1, tile_m // p)
    else:
        tm_p = max(8, _TARGET_STEP_BYTES // row_hbm)

    # Cap so the double-buffered footprint stays inside the v7x-safe budget.
    vmem_cap_rows = max(8, ((_VMEM_BUDGET_BYTES - resident) // row_vmem) // 8 * 8)
    tm_p = min(tm_p, vmem_cap_rows)

    if tm_p >= Mp:
        tm_p = Mp
    else:
        tm_p = max(8, (tm_p // 8) * 8)               # (8,128) sublane constraint
        if tm_p >= Mp:
            tm_p = Mp
        elif tile_m is None:
            # v7x has 2 TCs: prefer an even grid-step count when it costs nothing.
            steps = -(-Mp // tm_p)
            if steps > 1 and steps % 2 == 1:
                cand = ((-(-Mp // (steps + 1)) + 7) // 8) * 8
                if cand >= 8 and (-(-Mp // cand)) % 2 == 0:
                    tm_p = cand

    grid = (pl.cdiv(Mp, tm_p),)

    flops = 2 * M_pad * C * F
    transcendentals = 0 if cfg.activation == "identity" else M_pad * F
    bytes_accessed = (M_pad * C * x_bytes
                      + (p * C) * (p * F) * w_bytes
                      + p * F * 4
                      + M_pad * F * o_bytes)

    out_p = pl.pallas_call(
        functools.partial(_weighted_kernel, activation=cfg.activation,
                          scale=cfg.activation_scale),
        out_shape=jax.ShapeDtypeStruct((Mp, p * F), out_dtype),
        grid=grid,
        in_specs=[
            pl.BlockSpec((tm_p, p * C), lambda i: (i, 0)),
            pl.BlockSpec((p * C, p * F), lambda i: (0, 0)),   # resident weight
            pl.BlockSpec((1, p * F), lambda i: (0, 0)),       # resident bias
        ],
        out_specs=pl.BlockSpec((tm_p, p * F), lambda i: (i, 0)),
        compiler_params=pltpu.CompilerParams(
            dimension_semantics=("parallel",),
            vmem_limit_bytes=32 * 1024 * 1024),
        cost_estimate=pl.CostEstimate(flops=flops,
                                      transcendentals=transcendentals,
                                      bytes_accessed=bytes_accessed),
    )(xp, w_pack, b_pack)

    out = out_p.reshape(M_pad, F)                    # contiguous -> free
    if M_pad != M:
        out = out[:M]
    # Columns already ordered (num_heads = h*S + s, JO, JQ, JK, JV).
    return out.reshape(*batch_shape, cfg.num_heads, *j_dims)


# ---------------------------------------------------------------------------
# Pure-JAX reference matching the PyTorch forward exactly.
# ---------------------------------------------------------------------------
def direct_layer_reference(x, bias, weight, cfg: DirectLayerConfig):
    batch_shape = x.shape[:-1]
    S = cfg.sub_heads
    D = cfg.input_dim // S
    xs = x.reshape(*batch_shape, S, D)
    if cfg.weight:
        y = jnp.einsum("hsijkld,...sd->...hsijkl", weight, xs)
        y = y.reshape(*batch_shape, cfg.num_heads, cfg.JO, cfg.JQ, cfg.JK, cfg.JV)
        r = bias + y
    else:
        r = jnp.broadcast_to(bias, (*batch_shape, *bias.shape))
    return _activation_reference(r, cfg.activation, cfg.activation_scale)


if __name__ == "__main__":
    cfg = DirectLayerConfig()
    key = jax.random.PRNGKey(0)
    kx, kb, kw, kx2 = jax.random.split(key, 4)

    B, T = 2, 8                      # flattened M = 16
    x = jax.random.normal(kx, (B, T, cfg.input_dim), dtype=jnp.float32)

    # Deterministic synthetic parameter init (module zeros + reset_parameters).
    bias = 0.1 * jax.random.normal(
        kb, (cfg.num_heads, cfg.JO, cfg.JQ, cfg.JK, cfg.JV), dtype=jnp.float32)
    weight = 0.1 * jax.random.normal(
        kw,
        (cfg.num_heads // cfg.sub_heads, cfg.sub_heads,
         cfg.JO, cfg.JQ, cfg.JK, cfg.JV, cfg.input_dim // cfg.sub_heads),
        dtype=jnp.float32)

    # 1) weighted tanh path, auto pack / tile selection (single grid step).
    out = direct_layer_forward(x, bias, weight, cfg)
    jax.block_until_ready(out)
    ref = direct_layer_reference(x, bias, weight, cfg)
    np.testing.assert_allclose(np.asarray(out), np.asarray(ref),
                               rtol=1e-5, atol=1e-5)

    # 2) multi-step grid with M=204 (not a multiple of the pack factor):
    #    exercises pad-to-pack, packed reshape, and partial last-block masking.
    x_big = jax.random.normal(kx2, (4, 51, cfg.input_dim), dtype=jnp.float32)
    out_big = direct_layer_forward(x_big, bias, weight, cfg, tile_m=64)
    jax.block_until_ready(out_big)
    ref_big = direct_layer_reference(x_big, bias, weight, cfg)
    np.testing.assert_allclose(np.asarray(out_big), np.asarray(ref_big),
                               rtol=1e-5, atol=1e-5)

    # 3) weighted logsigmoid path (tests the sigmoid(x)**scale EUP rewrite).
    cfg_ls = DirectLayerConfig(activation="logsigmoid")
    out_ls = direct_layer_forward(x, bias, weight, cfg_ls)
    jax.block_until_ready(out_ls)
    ref_ls = direct_layer_reference(x, bias, weight, cfg_ls)
    np.testing.assert_allclose(np.asarray(out_ls), np.asarray(ref_ls),
                               rtol=1e-5, atol=1e-5)

    # 4) bias-only path (weight=False) -- plain jnp by design (64 elements).
    cfg_nb = DirectLayerConfig(weight=False, activation="logsigmoid")
    out_b = direct_layer_forward(x, bias, None, cfg_nb)
    jax.block_until_ready(out_b)
    ref_b = direct_layer_reference(x, bias, None, cfg_nb)
    np.testing.assert_allclose(np.asarray(out_b), np.asarray(ref_b),
                               rtol=1e-5, atol=1e-5)

    print("KERNEL_OK")
</pallas_src>

<mosaic_0001>
module attributes {stable_mosaic.version = 11 : i64} {
  func.func @_weighted_kernel(%arg0: i32, %arg1: memref<2x256xf32, #tpu.memory_space<vmem>>, %arg2: memref<256x512xf32, #tpu.memory_space<vmem>>, %arg3: memref<1x512xf32, #tpu.memory_space<vmem>>, %arg4: memref<2x512xf32, #tpu.memory_space<vmem>>) attributes {dimension_semantics = [#tpu.dimension_semantics<parallel>], iteration_bounds = array<i64: 1>, scalar_prefetch = 0 : i64, scratch_operands = 0 : i64, tpu.core_type = #tpu.core_type<tc>, window_params = [{transform_indices = @transform_0, window_bounds = array<i64: 2, 256>}, {pipeline_mode = #tpu.pipeline_mode<synchronous>, transform_indices = @transform_1, window_bounds = array<i64: 256, 512>}, {pipeline_mode = #tpu.pipeline_mode<synchronous>, transform_indices = @transform_2, window_bounds = array<i64: 1, 512>}, {transform_indices = @transform_3, window_bounds = array<i64: 2, 512>}]} {
    %c0 = arith.constant 0 : index
    %c0_0 = arith.constant 0 : index
    %0 = vector.load %arg1[%c0, %c0_0] : memref<2x256xf32, #tpu.memory_space<vmem>>, vector<2x256xf32>
    %c0_1 = arith.constant 0 : index
    %c0_2 = arith.constant 0 : index
    %1 = vector.load %arg2[%c0_1, %c0_2] : memref<256x512xf32, #tpu.memory_space<vmem>>, vector<256x512xf32>
    %cst = arith.constant dense<0.000000e+00> : vector<2x512xf32>
    %2 = tpu.matmul %0, %1, %cst {dimension_numbers = #tpu.dot_dimension_numbers<[1], [0], [0], [1], [0, 0, 1, 1], [], []>} : vector<2x256xf32>, vector<256x512xf32>, vector<2x512xf32> -> vector<2x512xf32>
    %c0_3 = arith.constant 0 : index
    %c0_4 = arith.constant 0 : index
    %3 = vector.load %arg3[%c0_3, %c0_4] : memref<1x512xf32, #tpu.memory_space<vmem>>, vector<1x512xf32>
    %4 = vector.broadcast %3 : vector<1x512xf32> to vector<2x512xf32>
    %5 = arith.addf %2, %4 : vector<2x512xf32>
    %cst_5 = arith.constant 5.000000e-01 : f32
    %6 = vector.broadcast %cst_5 : f32 to vector<2x512xf32>
    %7 = arith.mulf %5, %6 : vector<2x512xf32>
    %8 = math.tanh %7 : vector<2x512xf32>
    %cst_6 = arith.constant 2.000000e+00 : f32
    %9 = vector.broadcast %cst_6 : f32 to vector<2x512xf32>
    %10 = arith.mulf %9, %8 : vector<2x512xf32>
    %c0_7 = arith.constant 0 : index
    %c0_8 = arith.constant 0 : index
    %11 = vector.load %arg4[%c0_7, %c0_8] : memref<2x512xf32, #tpu.memory_space<vmem>>, vector<2x512xf32>
    tpu.vector_store %arg4[%c0_7, %c0_8], %10 {strides = array<i32>} : memref<2x512xf32, #tpu.memory_space<vmem>>, vector<2x512xf32>,
    return
  }
  func.func @transform_0(%arg0: i32) -> (i32, i32) {
    %c0_i32 = arith.constant 0 : i32
    %c0_i32_0 = arith.constant 0 : i32
    return %arg0, %c0_i32 : i32, i32
  }
  func.func @transform_1(%arg0: i32) -> (i32, i32) {
    %c0_i32 = arith.constant 0 : i32
    %c0_i32_0 = arith.constant 0 : i32
    %c0_i32_1 = arith.constant 0 : i32
    return %c0_i32, %c0_i32_0 : i32, i32
  }
  func.func @transform_2(%arg0: i32) -> (i32, i32) {
    %c0_i32 = arith.constant 0 : i32
    %c0_i32_0 = arith.constant 0 : i32
    %c0_i32_1 = arith.constant 0 : i32
    return %c0_i32, %c0_i32_0 : i32, i32
  }
  func.func @transform_3(%arg0: i32) -> (i32, i32) {
    %c0_i32 = arith.constant 0 : i32
    %c0_i32_0 = arith.constant 0 : i32
    return %arg0, %c0_i32 : i32, i32
  }
}

</mosaic_0001>

<bundles_post_ra>
// kernel: tpu_custom_call.1
= control target key start
LH: loop header
LB: loop body
LE: loop exit
PB: predicated region body
PF: predicated region fallthrough
CT: control target
= control target key end

     0   :  { %8 = vsyncpa [#allocation3], 0  ;;  %s689_s0 = inlined_call_operand.hbm [shape: f32[2,256], index: 0, kind: input, shape index: {}]   ;;  %s690_s1 = inlined_call_operand.hbm [shape: f32[256,512], index: 1, kind: input, shape index: {}]   ;;  %s691_s2 = inlined_call_operand.vmem [shape: f32[1,512], index: 2, kind: input, shape index: {}]   ;;  %s692_s3 = inlined_call_operand.hbm [shape: f32[2,512], index: 3, kind: output, shape index: {}]  }
   0x1   :  { %9 = vsyncpa [#allocation6], 0 }
   0x2   :  { %10 = vsyncpa [#allocation4], 0  ;;  %s611_s12 = smov [#allocation2]   ;;  %s612_s14 = smov [#allocation5]  }
   0x3   :  { %s17_s13 = sshll.u32 %s611_s12, 4  ;;  %s26_s15 = sshll.u32 %s612_s14, 4  ;;  %s18_s13 = int_to_ptr.vmem [resolvable:$true] %s17_s13  ;;  %s637_s15 = int_to_ptr.vmem [resolvable:$true] %s26_s15 }
   0x4   :  { %s539_s18 = scalar_lea.hbm %s689_s0, 64 }
   0x5   :  { %p540_p0 = scmp.ne.s32.totalorder %s689_s0, %s539_s18  ;;  %p543_p1 = scmp.lt.u32.totalorder %s539_s18, %s689_s0 }
   0x7   :  { %p545_p2 = pnand %p543_p1, %p540_p0 }
   0x9   :  { %548 = shalt.err (!%p545_p2)
}
   0xa   :  { %s549_s23 = scalar_lea.vmem %s18_s13, 64  ;;  %p554_p4 = scmp.lt.s32.totalorder %s18_s13, %s18_s13 }
   0xb   :  { %p550_p3 = scmp.ne.s32.totalorder %s18_s13, %s549_s23  ;;  %p555_p5 = scmp.lt.s32.totalorder %s549_s23, %s549_s23 }
   0xd   :  { %p556_p6 = por %p555_p5, %p554_p4 }
   0xf   :  { %p557_p7 = pnand %p556_p6, %p550_p3 }
  0x11   :  { %560 = shalt.err (!%p557_p7)
}
  0x12   :  { %20 = dma.hbm_to_vmem [thread:$0]  %s689_s0, 64, %s18_s13, [#allocation3]  }
  0x13   :  { %s561_s28 = scalar_lea.hbm %s690_s1, 16384 }
  0x14   :  { %p562_p8 = scmp.ne.s32.totalorder %s690_s1, %s561_s28  ;;  %p565_p9 = scmp.lt.u32.totalorder %s561_s28, %s690_s1 }
  0x16   :  { %p567_p10 = pnand %p565_p9, %p562_p8 }
  0x18   :  { %570 = shalt.err (!%p567_p10)
}
  0x19   :  { %s571_s6 = scalar_lea.vmem %s637_s15, 16384  ;;  %p576_p12 = scmp.lt.s32.totalorder %s637_s15, %s637_s15 }
  0x1a   :  { %p572_p11 = scmp.ne.s32.totalorder %s637_s15, %s571_s6  ;;  %p577_p13 = scmp.lt.s32.totalorder %s571_s6, %s571_s6 }
  0x1c   :  { %p578_p0 = por %p577_p13, %p576_p12 }
  0x1e   :  { %p579_p1 = pnand %p578_p0, %p572_p11 }
  0x20   :  { %582 = shalt.err (!%p579_p1)
}
  0x21   :  { %s613_s0 = smov 512   ;;  %s614_s7 = smov 32  }
  0x22   :  { %32 = dma.hbm_to_vmem [thread:$0]  %s690_s1, 16384, %s637_s15, [#allocation6], %s613_s0, %s613_s0, %s614_s7  }
  0x23   :  { %605 = dma.done.wait [#allocation3], 64  }
  0x24   :  { %606 = vsyncadd [#allocation3], 4294967232 }
  0x25   :  { %607 = dma.done.wait [#allocation6], 16384  }
  0x26   :  { %608 = vsyncadd [#allocation6], 4294950912  ;;  %v43_v0 = vld [vmem:[#allocation5 + $0x8] sm:$0xff]  ;;  %v45_v2 = vld [vmem:[#allocation5 + $0x18] sm:$0xff] }
  0x27   :  { %v47_v1 = vld [vmem:[#allocation5 + $0x28] sm:$0xff]  ;;  %v49_v4 = vld [vmem:[#allocation5 + $0x38] sm:$0xff]  ;;  %v42_v5 = vld [vmem:[#allocation5] sm:$0xff] }
  0x28   :  { %v397_v3 = vpack.c.bf16 %v47_v1, %v43_v0  ;;  %v46_v6 = vld [vmem:[#allocation5 + $0x20] sm:$0xff]  ;;  %v461_v7 = vpack.c.bf16 %v49_v4, %v45_v2  ;;  %v44_v9 = vld [vmem:[#allocation5 + $0x10] sm:$0xff]  ;;  %v51_v11 = vld [vmem:[#allocation5 + $0x48] sm:$0xff] }
  0x29   :  { %v399_v8 = vpack.c.bf16 %v46_v6, %v42_v5  ;;  %v48_v10 = vld [vmem:[#allocation5 + $0x30] sm:$0xff]  ;;  %v55_v13 = vld [vmem:[#allocation5 + $0x68] sm:$0xff]  ;;  %v53_v14 = vld [vmem:[#allocation5 + $0x58] sm:$0xff] }
  0x2a   :  { %398 = vmatprep.subr.bf16.mxu0 %v397_v3  ;;  %v463_v12 = vpack.c.bf16 %v48_v10, %v44_v9  ;;  %v57_v15 = vld [vmem:[#allocation5 + $0x78] sm:$0xff]  ;;  %462 = vmatprep.subr.bf16.mxu1 %v461_v7  ;;  %v401_v16 = vpack.c.bf16 %v55_v13, %v51_v11  ;;  %v50_v18 = vld [vmem:[#allocation5 + $0x40] sm:$0xff]  ;;  %v52_v20 = vld [vmem:[#allocation5 + $0x50] sm:$0xff] }
  0x2b   :  { %400 = vmatpush1.bf16.msra.mxu0 %v399_v8  ;;  %v465_v17 = vpack.c.bf16 %v57_v15, %v53_v14  ;;  %v54_v19 = vld [vmem:[#allocation5 + $0x60] sm:$0xff]  ;;  %v56_v22 = vld [vmem:[#allocation5 + $0x70] sm:$0xff]  ;;  %v59_v23 = vld [vmem:[#allocation5 + $0x88] sm:$0xff] }
  0x2c   :  { %464 = vmatpush1.bf16.msra.mxu1 %v463_v12  ;;  %v403_v21 = vpack.c.bf16 %v54_v19, %v50_v18  ;;  %v63_v24 = vld [vmem:[#allocation5 + $0xa8] sm:$0xff]  ;;  %402 = vmatprep.subr.bf16.mxu0 %v401_v16  ;;  %v467_v25 = vpack.c.bf16 %v56_v22, %v52_v20  ;;  %v61_v27 = vld [vmem:[#allocation5 + $0x98] sm:$0xff]  ;;  %v58_v29 = vld [vmem:[#allocation5 + $0x80] sm:$0xff] }
  0x2d   :  { %466 = vmatprep.subr.bf16.mxu1 %v465_v17  ;;  %v405_v26 = vpack.c.bf16 %v63_v24, %v59_v23  ;;  %v65_v28 = vld [vmem:[#allocation5 + $0xb8] sm:$0xff]  ;;  %v62_v31 = vld [vmem:[#allocation5 + $0xa0] sm:$0xff]  ;;  %v60_v32 = vld [vmem:[#allocation5 + $0x90] sm:$0xff] }
  0x2e   :  { %v469_v30 = vpack.c.bf16 %v65_v28, %v61_v27  ;;  %v64_v33 = vld [vmem:[#allocation5 + $0xb0] sm:$0xff]  ;;  %v407_v34 = vpack.c.bf16 %v62_v31, %v58_v29  ;;  %v67_v35 = vld [vmem:[#allocation5 + $0xc8] sm:$0xff]  ;;  %v69_v37 = vld [vmem:[#allocation5 + $0xd8] sm:$0xff] }
  0x2f   :  { %404 = vmatpush1.bf16.msra.mxu0 %v403_v21  ;;  %v71_v36 = vld [vmem:[#allocation5 + $0xe8] sm:$0xff]  ;;  %v471_v38 = vpack.c.bf16 %v64_v33, %v60_v32  ;;  %v73_v40 = vld [vmem:[#allocation5 + $0xf8] sm:$0xff]  ;;  %v66_v41 = vld [vmem:[#allocation5 + $0xc0] sm:$0xff] }
  0x30   :  { %468 = vmatpush1.bf16.msra.mxu1 %v467_v25  ;;  %406 = vmatprep.subr.bf16.mxu0 %v405_v26  ;;  %v409_v39 = vpack.c.bf16 %v71_v36, %v67_v35  ;;  %v70_v42 = vld [vmem:[#allocation5 + $0xe0] sm:$0xff]  ;;  %v473_v43 = vpack.c.bf16 %v73_v40, %v69_v37  ;;  %v68_v44 = vld [vmem:[#allocation5 + $0xd0] sm:$0xff]  ;;  %v75_v46 = vld [vmem:[#allocation5 + $0x108] sm:$0xff] }
  0x31   :  { %470 = vmatprep.subr.bf16.mxu1 %v469_v30  ;;  %v72_v45 = vld [vmem:[#allocation5 + $0xf0] sm:$0xff]  ;;  %v79_v47 = vld [vmem:[#allocation5 + $0x128] sm:$0xff]  ;;  %v77_v48 = vld [vmem:[#allocation5 + $0x118] sm:$0xff]  ;;  %v411_v50 = vpack.c.bf16 %v70_v42, %v66_v41 }
  0x32   :  { %v81_v49 = vld [vmem:[#allocation5 + $0x138] sm:$0xff]  ;;  %v475_v51 = vpack.c.bf16 %v72_v45, %v68_v44  ;;  %v413_v52 = vpack.c.bf16 %v79_v47, %v75_v46  ;;  %v74_v53 = vld [vmem:[#allocation5 + $0x100] sm:$0xff]  ;;  %v76_v55 = vld [vmem:[#allocation5 + $0x110] sm:$0xff] }
  0x33   :  { %408 = vmatpush1.bf16.msra.mxu0 %v407_v34  ;;  %v78_v54 = vld [vmem:[#allocation5 + $0x120] sm:$0xff]  ;;  %v477_v56 = vpack.c.bf16 %v81_v49, %v77_v48  ;;  %v80_v57 = vld [vmem:[#allocation5 + $0x130] sm:$0xff]  ;;  %v83_v58 = vld [vmem:[#allocation5 + $0x148] sm:$0xff] }
  0x34   :  { %472 = vmatpush1.bf16.msra.mxu1 %v471_v38  ;;  %410 = vmatprep.subr.bf16.mxu0 %v409_v39  ;;  %v87_v59 = vld [vmem:[#allocation5 + $0x168] sm:$0xff]  ;;  %v85_v60 = vld [vmem:[#allocation5 + $0x158] sm:$0xff]  ;;  %v415_v62 = vpack.c.bf16 %v78_v54, %v74_v53  ;;  %v479_v63 = vpack.c.bf16 %v80_v57, %v76_v55  ;;  %v82_v1 = vld [vmem:[#allocation5 + $0x140] sm:$0xff] }
  0x35   :  { %474 = vmatprep.subr.bf16.mxu1 %v473_v43  ;;  %v89_v61 = vld [vmem:[#allocation5 + $0x178] sm:$0xff]  ;;  %v417_v0 = vpack.c.bf16 %v87_v59, %v83_v58  ;;  %v86_v2 = vld [vmem:[#allocation5 + $0x160] sm:$0xff]  ;;  %v84_v3 = vld [vmem:[#allocation5 + $0x150] sm:$0xff] }
  0x36   :  { %v481_v4 = vpack.c.bf16 %v89_v61, %v85_v60  ;;  %v88_v5 = vld [vmem:[#allocation5 + $0x170] sm:$0xff]  ;;  %v91_v6 = vld [vmem:[#allocation5 + $0x188] sm:$0xff]  ;;  %v93_v8 = vld [vmem:[#allocation5 + $0x198] sm:$0xff]  ;;  %v419_v10 = vpack.c.bf16 %v86_v2, %v82_v1 }
  0x37   :  { %412 = vmatpush1.bf16.msra.mxu0 %v411_v50  ;;  %v95_v7 = vld [vmem:[#allocation5 + $0x1a8] sm:$0xff]  ;;  %v97_v9 = vld [vmem:[#allocation5 + $0x1b8] sm:$0xff]  ;;  %v483_v11 = vpack.c.bf16 %v88_v5, %v84_v3  ;;  %v90_v13 = vld [vmem:[#allocation5 + $0x180] sm:$0xff] }
  0x38   :  { %476 = vmatpush1.bf16.msra.mxu1 %v475_v51  ;;  %414 = vmatprep.subr.bf16.mxu0 %v413_v52  ;;  %v421_v12 = vpack.c.bf16 %v95_v7, %v91_v6  ;;  %v94_v14 = vld [vmem:[#allocation5 + $0x1a0] sm:$0xff]  ;;  %v92_v15 = vld [vmem:[#allocation5 + $0x190] sm:$0xff]  ;;  %v485_v16 = vpack.c.bf16 %v97_v9, %v93_v8  ;;  %v99_v18 = vld [vmem:[#allocation5 + $0x1c8] sm:$0xff] }
  0x39   :  { %478 = vmatprep.subr.bf16.mxu1 %v477_v56  ;;  %v96_v17 = vld [vmem:[#allocation5 + $0x1b0] sm:$0xff]  ;;  %v103_v19 = vld [vmem:[#allocation5 + $0x1e8] sm:$0xff]  ;;  %v101_v20 = vld [vmem:[#allocation5 + $0x1d8] sm:$0xff]  ;;  %v423_v22 = vpack.c.bf16 %v94_v14, %v90_v13 }
  0x3a   :  { %v105_v21 = vld [vmem:[#allocation5 + $0x1f8] sm:$0xff]  ;;  %v487_v23 = vpack.c.bf16 %v96_v17, %v92_v15  ;;  %v425_v24 = vpack.c.bf16 %v103_v19, %v99_v18  ;;  %v98_v25 = vld [vmem:[#allocation5 + $0x1c0] sm:$0xff]  ;;  %v100_v27 = vld [vmem:[#allocation5 + $0x1d0] sm:$0xff] }
  0x3b   :  { %416 = vmatpush1.bf16.msra.mxu0 %v415_v62  ;;  %v102_v26 = vld [vmem:[#allocation5 + $0x1e0] sm:$0xff]  ;;  %v489_v28 = vpack.c.bf16 %v105_v21, %v101_v20  ;;  %v104_v29 = vld [vmem:[#allocation5 + $0x1f0] sm:$0xff]  ;;  %v107_v30 = vld [vmem:[#allocation5 + $0x208] sm:$0xff] }
  0x3c   :  { %480 = vmatpush1.bf16.msra.mxu1 %v479_v63  ;;  %418 = vmatprep.subr.bf16.mxu0 %v417_v0  ;;  %v111_v31 = vld [vmem:[#allocation5 + $0x228] sm:$0xff]  ;;  %v109_v32 = vld [vmem:[#allocation5 + $0x218] sm:$0xff]  ;;  %v427_v34 = vpack.c.bf16 %v102_v26, %v98_v25  ;;  %v491_v35 = vpack.c.bf16 %v104_v29, %v100_v27  ;;  %v106_v37 = vld [vmem:[#allocation5 + $0x200] sm:$0xff] }
  0x3d   :  { %482 = vmatprep.subr.bf16.mxu1 %v481_v4  ;;  %v113_v33 = vld [vmem:[#allocation5 + $0x238] sm:$0xff]  ;;  %v429_v36 = vpack.c.bf16 %v111_v31, %v107_v30  ;;  %v110_v38 = vld [vmem:[#allocation5 + $0x220] sm:$0xff]  ;;  %v108_v39 = vld [vmem:[#allocation5 + $0x210] sm:$0xff] }
  0x3e   :  { %v493_v40 = vpack.c.bf16 %v113_v33, %v109_v32  ;;  %v112_v41 = vld [vmem:[#allocation5 + $0x230] sm:$0xff]  ;;  %v115_v42 = vld [vmem:[#allocation5 + $0x248] sm:$0xff]  ;;  %v117_v44 = vld [vmem:[#allocation5 + $0x258] sm:$0xff]  ;;  %v431_v46 = vpack.c.bf16 %v110_v38, %v106_v37 }
  0x3f   :  { %420 = vmatpush1.bf16.msra.mxu0 %v419_v10  ;;  %v119_v43 = vld [vmem:[#allocation5 + $0x268] sm:$0xff]  ;;  %v121_v45 = vld [vmem:[#allocation5 + $0x278] sm:$0xff]  ;;  %v495_v47 = vpack.c.bf16 %v112_v41, %v108_v39  ;;  %v114_v49 = vld [vmem:[#allocation5 + $0x240] sm:$0xff] }
  0x40   :  { %484 = vmatpush1.bf16.msra.mxu1 %v483_v11  ;;  %422 = vmatprep.subr.bf16.mxu0 %v421_v12  ;;  %v433_v48 = vpack.c.bf16 %v119_v43, %v115_v42  ;;  %v118_v50 = vld [vmem:[#allocation5 + $0x260] sm:$0xff]  ;;  %v116_v51 = vld [vmem:[#allocation5 + $0x250] sm:$0xff]  ;;  %v497_v52 = vpack.c.bf16 %v121_v45, %v117_v44  ;;  %v123_v54 = vld [vmem:[#allocation5 + $0x288] sm:$0xff] }
  0x41   :  { %486 = vmatprep.subr.bf16.mxu1 %v485_v16  ;;  %v120_v53 = vld [vmem:[#allocation5 + $0x270] sm:$0xff]  ;;  %v127_v55 = vld [vmem:[#allocation5 + $0x2a8] sm:$0xff]  ;;  %v125_v56 = vld [vmem:[#allocation5 + $0x298] sm:$0xff]  ;;  %v435_v58 = vpack.c.bf16 %v118_v50, %v114_v49 }
  0x42   :  { %v129_v57 = vld [vmem:[#allocation5 + $0x2b8] sm:$0xff]  ;;  %v499_v59 = vpack.c.bf16 %v120_v53, %v116_v51  ;;  %v437_v60 = vpack.c.bf16 %v127_v55, %v123_v54  ;;  %v122_v61 = vld [vmem:[#allocation5 + $0x280] sm:$0xff]  ;;  %v124_v63 = vld [vmem:[#allocation5 + $0x290] sm:$0xff] }
  0x43   :  { %424 = vmatpush1.bf16.msra.mxu0 %v423_v22  ;;  %v126_v62 = vld [vmem:[#allocation5 + $0x2a0] sm:$0xff]  ;;  %v501_v0 = vpack.c.bf16 %v129_v57, %v125_v56  ;;  %v128_v1 = vld [vmem:[#allocation5 + $0x2b0] sm:$0xff]  ;;  %v131_v2 = vld [vmem:[#allocation5 + $0x2c8] sm:$0xff] }
  0x44   :  { %488 = vmatpush1.bf16.msra.mxu1 %v487_v23  ;;  %426 = vmatprep.subr.bf16.mxu0 %v425_v24  ;;  %v135_v3 = vld [vmem:[#allocation5 + $0x2e8] sm:$0xff]  ;;  %v133_v4 = vld [vmem:[#allocation5 + $0x2d8] sm:$0xff]  ;;  %v439_v6 = vpack.c.bf16 %v126_v62, %v122_v61  ;;  %v130_v7 = vld [vmem:[#allocation5 + $0x2c0] sm:$0xff]  ;;  %v503_v8 = vpack.c.bf16 %v128_v1, %v124_v63 }
  0x45   :  { %490 = vmatprep.subr.bf16.mxu1 %v489_v28  ;;  %v137_v5 = vld [vmem:[#allocation5 + $0x2f8] sm:$0xff]  ;;  %v441_v9 = vpack.c.bf16 %v135_v3, %v131_v2  ;;  %v134_v10 = vld [vmem:[#allocation5 + $0x2e0] sm:$0xff]  ;;  %v132_v11 = vld [vmem:[#allocation5 + $0x2d0] sm:$0xff]  ;;  %v172_v2 = vlaneseq }
  0x46   :  { %v136_v12 = vld [vmem:[#allocation5 + $0x2f0] sm:$0xff]  ;;  %v505_v13 = vpack.c.bf16 %v137_v5, %v133_v4  ;;  %v139_v14 = vld [vmem:[#allocation5 + $0x308] sm:$0xff]  ;;  %v668_v16 = vld.sshfl [vmem:[#allocation2] sm:$0x33 pattern:$0x76325410]  ;;  %v443_v20 = vpack.c.bf16 %v134_v10, %v130_v7 }
  0x47   :  { %428 = vmatpush1.bf16.msra.mxu0 %v427_v34  ;;  %v143_v15 = vld [vmem:[#allocation5 + $0x328] sm:$0xff]  ;;  %v141_v17 = vld [vmem:[#allocation5 + $0x318] sm:$0xff]  ;;  %v200_v19 = vcombine.high %v668_v16, %v668_v16  ;;  %v507_v21 = vpack.c.bf16 %v136_v12, %v132_v11  ;;  %v138_v23 = vld [vmem:[#allocation5 + $0x300] sm:$0xff]  ;;  %v173_v3 = vshrl.u32 %v172_v2, 7 }
  0x48   :  { %492 = vmatpush1.bf16.msra.mxu1 %v491_v35  ;;  %430 = vmatprep.subr.bf16.mxu0 %v429_v36  ;;  %v145_v18 = vld [vmem:[#allocation5 + $0x338] sm:$0xff]  ;;  %v445_v22 = vpack.c.bf16 %v143_v15, %v139_v14  ;;  %v142_v24 = vld [vmem:[#allocation5 + $0x320] sm:$0xff]  ;;  %v140_v25 = vld [vmem:[#allocation5 + $0x310] sm:$0xff] }
  0x49   :  { %494 = vmatprep.subr.bf16.mxu1 %v493_v40  ;;  %v509_v26 = vpack.c.bf16 %v145_v18, %v141_v17  ;;  %v144_v27 = vld [vmem:[#allocation5 + $0x330] sm:$0xff]  ;;  %v147_v28 = vld [vmem:[#allocation5 + $0x348] sm:$0xff]  ;;  %267 = vmatprep.mubr.f32.mxu0 %v200_v19  ;;  %v149_v30 = vld [vmem:[#allocation5 + $0x358] sm:$0xff]  ;;  %v447_v32 = vpack.c.bf16 %v142_v24, %v138_v23  ;;  %v174_v4 = vsub.s32 0, %v173_v3  ;;  %v178_v7 = vsub.s32 1, %v173_v3 }
  0x4a   :  { %v151_v29 = vld [vmem:[#allocation5 + $0x368] sm:$0xff]  ;;  %v153_v31 = vld [vmem:[#allocation5 + $0x378] sm:$0xff]  ;;  %338 = vmatprep.mubr.f32.mxu1 %v200_v19  ;;  %v511_v33 = vpack.c.bf16 %v144_v27, %v140_v25  ;;  %v146_v35 = vld [vmem:[#allocation5 + $0x340] sm:$0xff]  ;;  %v615_v25 = vmov 1983009808  }
  0x4b   :  { %432 = vmatpush1.bf16.msra.mxu0 %v431_v46  ;;  %v449_v34 = vpack.c.bf16 %v151_v29, %v147_v28  ;;  %v150_v36 = vld [vmem:[#allocation5 + $0x360] sm:$0xff]  ;;  %v148_v37 = vld [vmem:[#allocation5 + $0x350] sm:$0xff]  ;;  %v513_v38 = vpack.c.bf16 %v153_v31, %v149_v30  ;;  %v155_v40 = vld [vmem:[#allocation5 + $0x388] sm:$0xff] }
  0x4c   :  { %496 = vmatpush1.bf16.msra.mxu1 %v495_v47  ;;  %434 = vmatprep.subr.bf16.mxu0 %v433_v48  ;;  %v152_v39 = vld [vmem:[#allocation5 + $0x370] sm:$0xff]  ;;  %v159_v41 = vld [vmem:[#allocation5 + $0x3a8] sm:$0xff]  ;;  %v157_v42 = vld [vmem:[#allocation5 + $0x398] sm:$0xff]  ;;  %v451_v44 = vpack.c.bf16 %v150_v36, %v146_v35 }
  0x4d   :  { %498 = vmatprep.subr.bf16.mxu1 %v497_v52  ;;  %v161_v43 = vld [vmem:[#allocation5 + $0x3b8] sm:$0xff]  ;;  %v515_v45 = vpack.c.bf16 %v152_v39, %v148_v37  ;;  %v453_v46 = vpack.c.bf16 %v159_v41, %v155_v40  ;;  %v154_v47 = vld [vmem:[#allocation5 + $0x380] sm:$0xff]  ;;  %v156_v49 = vld [vmem:[#allocation5 + $0x390] sm:$0xff] }
  0x4e   :  { %v158_v48 = vld [vmem:[#allocation5 + $0x3a0] sm:$0xff]  ;;  %v517_v50 = vpack.c.bf16 %v161_v43, %v157_v42  ;;  %v160_v51 = vld [vmem:[#allocation5 + $0x3b0] sm:$0xff]  ;;  %v163_v52 = vld [vmem:[#allocation5 + $0x3c8] sm:$0xff] }
  0x4f   :  { %436 = vmatpush1.bf16.msra.mxu0 %v435_v58  ;;  %v167_v53 = vld [vmem:[#allocation5 + $0x3e8] sm:$0xff]  ;;  %v165_v54 = vld [vmem:[#allocation5 + $0x3d8] sm:$0xff]  ;;  %v455_v56 = vpack.c.bf16 %v158_v48, %v154_v47  ;;  %v519_v57 = vpack.c.bf16 %v160_v51, %v156_v49  ;;  %v164_v62 = vld [vmem:[#allocation5 + $0x3d0] sm:$0xff] }
  0x50   :  { %500 = vmatpush1.bf16.msra.mxu1 %v499_v59  ;;  %438 = vmatprep.subr.bf16.mxu0 %v437_v60  ;;  %v169_v55 = vld [vmem:[#allocation5 + $0x3f8] sm:$0xff]  ;;  %v457_v58 = vpack.c.bf16 %v167_v53, %v163_v52  ;;  %v162_v59 = vld [vmem:[#allocation5 + $0x3c0] sm:$0xff]  ;;  %v168_v63 = vld [vmem:[#allocation5 + $0x3f0] sm:$0xff] }
  0x51   :  { %502 = vmatprep.subr.bf16.mxu1 %v501_v0  ;;  %v166_v60 = vld [vmem:[#allocation5 + $0x3e0] sm:$0xff]  ;;  %v521_v61 = vpack.c.bf16 %v169_v55, %v165_v54  ;;  %v523_v1 = vpack.c.bf16 %v168_v63, %v164_v62  ;;  %v170_v5 = vld [vmem:[%s691_s2] sm:$0xf]  ;;  %s616_s2 = smov [#allocation7]  }
  0x52   :  { %v459_v0 = vpack.c.bf16 %v166_v60, %v162_v59  ;;  %v179_v11 = vrot.slane %v170_v5, %v178_v7  ;;  %s386_s11 = sshll.u32 %s616_s2, 4  ;;  %s387_s11 = int_to_ptr.vmem [resolvable:$true] %s386_s11 }
  0x53   :  { %440 = vmatpush1.bf16.msra.mxu0 %v439_v6  ;;  %v182_v6 = vsub.s32 2, %v173_v3  ;;  %s583_s12 = scalar_lea.vmem %s387_s11, 128  ;;  %p588_p3 = scmp.lt.s32.totalorder %s387_s11, %s387_s11 }
  0x54   :  { %504 = vmatpush1.bf16.msra.mxu1 %v503_v8  ;;  %442 = vmatprep.subr.bf16.mxu0 %v441_v9  ;;  %v186_v8 = vsub.s32 3, %v173_v3  ;;  %v175_v9 = vrot.slane %v170_v5, %v174_v4  ;;  %p584_p2 = scmp.ne.s32.totalorder %s387_s11, %s583_s12  ;;  %p589_p4 = scmp.lt.s32.totalorder %s583_s12, %s583_s12 }
  0x55   :  { %506 = vmatprep.subr.bf16.mxu1 %v505_v13  ;;  %v183_v10 = vrot.slane %v170_v5, %v182_v6 }
  0x56   :  { %v187_v12 = vrot.slane %v170_v5, %v186_v8  ;;  %p590_p5 = por %p589_p4, %p588_p3 }
  0x57   :  { %444 = vmatpush1.bf16.msra.mxu0 %v443_v20 }
  0x58   :  { %508 = vmatpush1.bf16.msra.mxu1 %v507_v21  ;;  %446 = vmatprep.subr.bf16.mxu0 %v445_v22  ;;  %p591_p6 = pnand %p590_p5, %p584_p2 }
  0x59   :  { %510 = vmatprep.subr.bf16.mxu1 %v509_v26  ;;  %v364_v26 = vunpack.c.l.s4 %v615_v25 }
  0x5b   :  { %448 = vmatpush1.bf16.msra.mxu0 %v447_v32  ;;  %v365_v27 = vunpack.c.0.s8 %v364_v26 }
  0x5c   :  { %512 = vmatpush1.bf16.msra.mxu1 %v511_v33  ;;  %450 = vmatprep.subr.bf16.mxu0 %v449_v34 }
  0x5d   :  { %514 = vmatprep.subr.bf16.mxu1 %v513_v38  ;;  %v368_v35 = vsub.s32 %v365_v27, %v173_v3 }
  0x5f   :  { %452 = vmatpush1.bf16.msra.mxu0 %v451_v44 }
  0x60   :  { %516 = vmatpush1.bf16.msra.mxu1 %v515_v45  ;;  %454 = vmatprep.subr.bf16.mxu0 %v453_v46 }
  0x61   :  { %518 = vmatprep.subr.bf16.mxu1 %v517_v50 }
  0x63   :  { %456 = vmatpush1.bf16.msra.mxu0 %v455_v56 }
  0x64   :  { %520 = vmatpush1.bf16.msra.mxu1 %v519_v57  ;;  %458 = vmatprep.subr.bf16.mxu0 %v457_v58 }
  0x65   :  { %522 = vmatprep.subr.bf16.mxu1 %v521_v61 }
  0x67   :  { %460 = vmatpush1.bf16.msra.mxu0 %v459_v0 }
  0x68   :  { %524 = vmatpush1.bf16.msra.mxu1 %v523_v1 }
  0x6a   :  { %268 = vmatmul.mubr.f32.vlgmr.msra.gmra.mrb[0].mxu0 %v668_v16 }
  0x6b   :  { %339 = vmatmul.mubr.f32.vlgmr.msra.gmra.mrb[0].mxu1 %v668_v16 }
 0x13d   :  { %v269_v13 = vpop.f32.mrb[0].mxu0 }
 0x13e   :  { %v270_v14 = vadd.f32 %v269_v13, %v175_v9  ;;  %v340_v15 = vpop.f32.mrb[0].mxu1  ;;  %v271_v17 = vpop.f32.mrb[1].mxu0 }
 0x13f   :  { %v341_v18 = vadd.f32 %v340_v15, %v183_v10  ;;  %v272_v16 = vadd.f32 %v271_v17, %v179_v11  ;;  %v342_v19 = vpop.f32.mrb[1].mxu1 }
 0x140   :  { %v345_v20 = vmul.f32 0.5, %v270_v14  ;;  %v343_v21 = vadd.f32 %v342_v19, %v187_v12 }
 0x141   :  { %v347_v22 = vmul.f32 0.5, %v341_v18  ;;  %v346_v23 = vmul.f32 0.5, %v272_v16 }
 0x142   :  { %531 = vtanh.f32 %v345_v20  ;;  %v348_v24 = vmul.f32 0.5, %v343_v21 }
 0x143   :  { %533 = vtanh.f32 %v347_v22 }
 0x144   :  { %535 = vtanh.f32 %v346_v23 }
 0x145   :  { %537 = vtanh.f32 %v348_v24 }
 0x14c   :  { %v532_v28 = vpop.eup %531 }
 0x14d   :  { %v534_v29 = vpop.eup %533  ;;  %v353_v30 = vmul.f32 2.0, %v532_v28 }
 0x14e   :  { %v536_v31 = vpop.eup %535  ;;  %v355_v32 = vmul.f32 2.0, %v534_v29 }
 0x14f   :  { %v538_v33 = vpop.eup %537  ;;  %v354_v34 = vmul.f32 2.0, %v536_v31 }
 0x150   :  { %v356_v36 = vmul.f32 2.0, %v538_v33 }
 0x151   :  { %v361_v37 = vcombine.low %v353_v30, %v354_v34 }
 0x152   :  { %v362_v38 = vcombine.low %v355_v32, %v356_v36 }
 0x153   :  { %v369_v39 = vrot.slane %v361_v37, %v368_v35 }
 0x154   :  { %v376_v40 = vrot.slane %v362_v38, %v368_v35 }
 0x156   :  { %v377_v41 = vcombine.low %v369_v39, %v376_v40 }
 0x158   :  { %379 = vst [vmem:[#allocation7] sm:$0xff] %v377_v41 }
 0x159   :  { %594 = shalt.err (!%p591_p6)
}
 0x15a   :  { %s595_s15 = scalar_lea.hbm %s692_s3, 128 }
 0x15b   :  { %p596_p7 = scmp.ne.s32.totalorder %s692_s3, %s595_s15  ;;  %p599_p8 = scmp.lt.u32.totalorder %s595_s15, %s692_s3 }
 0x15d   :  { %p601_p9 = pnand %p599_p8, %p596_p7 }
 0x15f   :  { %604 = shalt.err (!%p601_p9)
}
 0x160   :  { %389 = dma.vmem_to_hbm [thread:$0]  %s387_s11, 128, %s692_s3, [#allocation4]  }
 0x161   :  { %609 = dma.done.wait [#allocation4], 128  }
 0x162   :  { %610 = vsyncadd [#allocation4], 4294967168 }
 0x163   :  { %393 = vsyncpa [#allocation3], 1 }
 0x164   :  { %394 = vsyncpa [#allocation6], 1 }
 0x165   :  { %395 = vsyncpa [#allocation4], 1 }

</bundles_post_ra>
